<compile_context>
chip_gen: v7x
topology: tpu7x:2x2x1
jax: 0.10.0
libtpu: 0.0.40
codegen_flags: <defaults>
</compile_context>

<pallas_src>
import functools

import jax
import jax.numpy as jnp
from jax import lax
from jax.experimental import pallas as pl
from jax.experimental.pallas import tpu as pltpu


def por_kernel(ids_ref,     # (B_tile, 3L) int32 token ids, already offset into [0, 3V)
               tbl_ref,     # (3V, H) bf16 stacked fc1-folded tables
               b1_ref,      # (1, H) f32 fc1 bias
               w2_ref,      # (1, H) f32 fc2 weight row
               bias_ref,    # (1, OUT_PAD) f32 ordinal bias (lane-padded)
               out_ref):    # (B_tile, OUT_PAD) f32
    Bt, L3 = ids_ref.shape
    V3, H = tbl_ref.shape
    inv_L = 3.0 / L3                     # each table's mean divides by L = L3 // 3

    ids = ids_ref[...]
    iota_v = lax.broadcasted_iota(jnp.int32, (Bt, V3), 1)

    # (B_tile, 3V) token counts: short static VPU loop, int32 accumulation,
    # single cast after the loop (no per-iteration int->float converts).
    cnt = jnp.zeros((Bt, V3), jnp.int32)
    for l in range(L3):                  # L3 is small & static -> fully unrolled
        cnt = cnt + (ids[:, l:l + 1] == iota_v).astype(jnp.int32)
    cnt_bf16 = cnt.astype(jnp.float32).astype(jnp.bfloat16)   # counts are small ints, exact in bf16

    # Single fused bf16 MXU matmul (K = 3V), f32 accumulation.
    h = jnp.dot(cnt_bf16, tbl_ref[...], preferred_element_type=jnp.float32)
    h = h * inv_L + b1_ref[...]          # mean over sequence + fc1 bias
    h = jnp.maximum(h, 0.0)              # ReLU

    # fc2 (H -> 1, no bias): VPU multiply + lane reduction instead of a 1-column matmul.
    y = jnp.sum(h * w2_ref[...], axis=-1, keepdims=True)      # (Bt, 1)

    # Ordinal bias broadcast; lane-dense store, sliced back in the wrapper.
    out_ref[...] = y + bias_ref[...]


def fold_por_params(params):
    """One-time (model-load) folding of fc1 into the embedding tables.

    Returns arrays to feed the jitted forward; keeps the 3*V*E*H folding MACs
    and the emb_* HBM traffic off the inference critical path.
    """
    V, E = params["emb_word"].shape
    H = params["w1"].shape[1]
    Km1 = params["bias_cls"].shape[-1]

    w1 = params["w1"].astype(jnp.float32)
    tw = jnp.dot(params["emb_word"].astype(jnp.float32), w1[:E])
    tb = jnp.dot(params["emb_bigram"].astype(jnp.float32), w1[E:2 * E])
    tt = jnp.dot(params["emb_trigram"].astype(jnp.float32), w1[2 * E:])
    # Stack along the vocab axis -> one (3V, H) bf16 table (MXU is bf16-native).
    table = jnp.concatenate([tw, tb, tt], axis=0).astype(jnp.bfloat16)

    b1 = params["b1"].reshape(1, H).astype(jnp.float32)
    w2 = params["w2"].reshape(1, H).astype(jnp.float32)

    # Lane-dense output slab (multiple of 128) so the store is an unmasked vst.
    out_pad = pl.cdiv(max(Km1, 1), 128) * 128
    bias_pad = jnp.zeros((1, out_pad), jnp.float32).at[:, :Km1].set(
        params["bias_cls"].reshape(1, Km1).astype(jnp.float32))

    return dict(table=table, b1=b1, w2=w2, bias_pad=bias_pad)


def _vmem_capacity_bytes():
    try:
        return int(pltpu.get_tpu_info().vmem_capacity_bytes)
    except Exception:
        return 64 * 1024 * 1024          # conservative (v7x per-TensorCore)


def _pick_batch_tile(batch, requested):
    """Sublane-aligned batch tile; avoid over-padding tiny batches and keep
    >=2 grid steps when the batch allows (so both v7x TensorCores get work)."""
    b_pad8 = pl.cdiv(batch, 8) * 8
    tile = min(requested, b_pad8)
    if b_pad8 // tile < 2 and tile > 8:
        tile = max(8, pl.cdiv(pl.cdiv(b_pad8, 2), 8) * 8)
    return tile


@functools.partial(jax.jit, static_argnames=("num_out", "b_tile"))
def por_forward(idx_word, idx_bigram, idx_trigram, folded, *, num_out, b_tile=256):
    B, L = idx_word.shape
    table = folded["table"]                      # (3V, H) bf16
    V3, H = table.shape
    V = V3 // 3
    out_pad = folded["bias_pad"].shape[-1]

    # Fuse the three index streams: offset bigram/trigram ids into [V, 2V) / [2V, 3V)
    # and concatenate along the sequence axis -> one (B, 3L) id tensor.
    ids = jnp.concatenate(
        [idx_word.astype(jnp.int32),
         idx_bigram.astype(jnp.int32) + V,
         idx_trigram.astype(jnp.int32) + 2 * V], axis=1)      # (B, 3L)

    tile = _pick_batch_tile(B, b_tile)
    b_pad = pl.cdiv(B, tile) * tile
    ids = jnp.pad(ids, ((0, b_pad - B), (0, 0)))              # padded rows sliced off below
    grid = (b_pad // tile,)

    ids_spec = pl.BlockSpec((tile, 3 * L), lambda i: (i, 0))
    tbl_spec = pl.BlockSpec((V3, H), lambda i: (0, 0))        # grid-invariant (resident)
    row_spec = pl.BlockSpec((1, H), lambda i: (0, 0))
    bias_spec = pl.BlockSpec((1, out_pad), lambda i: (0, 0))
    out_spec = pl.BlockSpec((tile, out_pad), lambda i: (i, 0))

    # Footprint-derived, generation-aware VMEM limit (double-buffered inputs,
    # double-buffered output block), with headroom under the physical capacity.
    tbl_bytes = V3 * H * 2
    ids_blk = tile * 3 * L * 4
    out_blk = tile * out_pad * 4
    small = (2 * H + out_pad) * 4
    footprint = 2 * (tbl_bytes + ids_blk + small) + 2 * out_blk
    cap = _vmem_capacity_bytes()
    headroom_cap = min(100 * 1024 * 1024, cap - 16 * 1024 * 1024)
    vmem_limit = int(max(32 * 1024 * 1024, min(headroom_cap, 4 * footprint)))

    out_full = pl.pallas_call(
        por_kernel,
        out_shape=jax.ShapeDtypeStruct((b_pad, out_pad), jnp.float32),
        grid=grid,
        in_specs=[ids_spec, tbl_spec, row_spec, row_spec, bias_spec],
        out_specs=out_spec,
        compiler_params=pltpu.CompilerParams(
            dimension_semantics=("parallel",),
            vmem_limit_bytes=vmem_limit,
        ),
    )(ids, table, folded["b1"], folded["w2"], folded["bias_pad"])

    return out_full[:B, :num_out]


def por_reference(idx_word, idx_bigram, idx_trigram, params):
    """Pure-JAX f32 reference mirroring the PyTorch forward (dropout = identity)."""
    ow = params["emb_word"][idx_word]                         # (B, L, E)
    ob = params["emb_bigram"][idx_bigram]
    ot = params["emb_trigram"][idx_trigram]
    out = jnp.concatenate([ow, ob, ot], axis=-1).mean(axis=1)  # (B, 3E)
    h = jnp.maximum(out @ params["w1"] + params["b1"], 0.0)
    return h @ params["w2"] + params["bias_cls"]


if __name__ == "__main__":
    # Small config consistent with the module's __init__.
    B, L = 2, 8            # batch, sequence length
    V = 64                 # n_gram_vocab (== n_vocab here)
    E = 32                 # embed
    H = 32                 # hidden_size
    NUM_CLASSES = 5        # num_classes -> output width = 4

    key = jax.random.PRNGKey(0)
    k = jax.random.split(key, 10)

    emb_word = 0.1 * jax.random.normal(k[0], (V, E), jnp.float32)
    emb_word = emb_word.at[V - 1].set(0.0)     # padding_idx = n_vocab - 1
    emb_bigram = 0.1 * jax.random.normal(k[1], (V, E), jnp.float32)
    emb_trigram = 0.1 * jax.random.normal(k[2], (V, E), jnp.float32)

    fan_in1 = 3 * E
    w1 = jax.random.uniform(k[3], (3 * E, H), jnp.float32,
                            -1.0 / jnp.sqrt(fan_in1), 1.0 / jnp.sqrt(fan_in1))
    b1 = jax.random.uniform(k[4], (1, H), jnp.float32,
                            -1.0 / jnp.sqrt(fan_in1), 1.0 / jnp.sqrt(fan_in1))
    w2 = jax.random.uniform(k[5], (H, 1), jnp.float32,
                            -1.0 / jnp.sqrt(H), 1.0 / jnp.sqrt(H))
    bias_cls = jnp.zeros((1, NUM_CLASSES - 1), jnp.float32)   # linear_1_bias init

    params = dict(emb_word=emb_word, emb_bigram=emb_bigram, emb_trigram=emb_trigram,
                  w1=w1, b1=b1, w2=w2, bias_cls=bias_cls)

    # One-time model-load folding (outside the jitted forward path).
    folded = fold_por_params(params)

    # x[0], x[2], x[3] from the PyTorch forward: three index tensors.
    idx_word = jax.random.randint(k[6], (B, L), 0, V, jnp.int32)
    idx_bigram = jax.random.randint(k[7], (B, L), 0, V, jnp.int32)
    idx_trigram = jax.random.randint(k[8], (B, L), 0, V, jnp.int32)

    out = por_forward(idx_word, idx_bigram, idx_trigram, folded,
                      num_out=NUM_CLASSES - 1)
    out = jax.block_until_ready(out)

    ref = por_reference(idx_word, idx_bigram, idx_trigram, params)
    assert out.shape == (B, NUM_CLASSES - 1)
    # Tolerance loosened vs. the f32 version: tables are bf16 (f32 accumulation).
    assert jnp.allclose(out, ref, atol=1e-2, rtol=1e-2), (out, ref)

    print("KERNEL_OK")
</pallas_src>

<mosaic_0001>
module attributes {stable_mosaic.version = 11 : i64} {
  func.func @por_kernel(%arg0: i32, %arg1: memref<8x24xi32, #tpu.memory_space<vmem>>, %arg2: memref<192x32xbf16, #tpu.memory_space<vmem>>, %arg3: memref<1x32xf32, #tpu.memory_space<vmem>>, %arg4: memref<1x32xf32, #tpu.memory_space<vmem>>, %arg5: memref<1x128xf32, #tpu.memory_space<vmem>>, %arg6: memref<8x128xf32, #tpu.memory_space<vmem>>) attributes {dimension_semantics = [#tpu.dimension_semantics<parallel>], iteration_bounds = array<i64: 1>, scalar_prefetch = 0 : i64, scratch_operands = 0 : i64, tpu.core_type = #tpu.core_type<tc>, window_params = [{transform_indices = @transform_0, window_bounds = array<i64: 8, 24>}, {pipeline_mode = #tpu.pipeline_mode<synchronous>, transform_indices = @transform_1, window_bounds = array<i64: 192, 32>}, {pipeline_mode = #tpu.pipeline_mode<synchronous>, transform_indices = @transform_2, window_bounds = array<i64: 1, 32>}, {pipeline_mode = #tpu.pipeline_mode<synchronous>, transform_indices = @transform_3, window_bounds = array<i64: 1, 32>}, {pipeline_mode = #tpu.pipeline_mode<synchronous>, transform_indices = @transform_4, window_bounds = array<i64: 1, 128>}, {transform_indices = @transform_5, window_bounds = array<i64: 8, 128>}]} {
    %c0 = arith.constant 0 : index
    %c0_0 = arith.constant 0 : index
    %0 = vector.load %arg1[%c0, %c0_0] : memref<8x24xi32, #tpu.memory_space<vmem>>, vector<8x24xi32>
    %1 = tpu.iota {dimensions = array<i32: 1>} : vector<8x192xi32>
    %c0_i32 = arith.constant 0 : i32
    %2 = vector.broadcast %c0_i32 : i32 to vector<8x192xi32>
    %3 = vector.extract_strided_slice %0 {offsets = [0, 0], sizes = [8, 1], strides = [1, 1]} : vector<8x24xi32> to vector<8x1xi32>
    %4 = vector.broadcast %3 : vector<8x1xi32> to vector<8x192xi32>
    %5 = arith.cmpi eq, %4, %1 : vector<8x192xi32>
    %6 = arith.extui %5 : vector<8x192xi1> to vector<8x192xi32>
    %7 = arith.addi %2, %6 : vector<8x192xi32>
    %8 = vector.extract_strided_slice %0 {offsets = [0, 1], sizes = [8, 1], strides = [1, 1]} : vector<8x24xi32> to vector<8x1xi32>
    %9 = vector.broadcast %8 : vector<8x1xi32> to vector<8x192xi32>
    %10 = arith.cmpi eq, %9, %1 : vector<8x192xi32>
    %11 = arith.extui %10 : vector<8x192xi1> to vector<8x192xi32>
    %12 = arith.addi %7, %11 : vector<8x192xi32>
    %13 = vector.extract_strided_slice %0 {offsets = [0, 2], sizes = [8, 1], strides = [1, 1]} : vector<8x24xi32> to vector<8x1xi32>
    %14 = vector.broadcast %13 : vector<8x1xi32> to vector<8x192xi32>
    %15 = arith.cmpi eq, %14, %1 : vector<8x192xi32>
    %16 = arith.extui %15 : vector<8x192xi1> to vector<8x192xi32>
    %17 = arith.addi %12, %16 : vector<8x192xi32>
    %18 = vector.extract_strided_slice %0 {offsets = [0, 3], sizes = [8, 1], strides = [1, 1]} : vector<8x24xi32> to vector<8x1xi32>
    %19 = vector.broadcast %18 : vector<8x1xi32> to vector<8x192xi32>
    %20 = arith.cmpi eq, %19, %1 : vector<8x192xi32>
    %21 = arith.extui %20 : vector<8x192xi1> to vector<8x192xi32>
    %22 = arith.addi %17, %21 : vector<8x192xi32>
    %23 = vector.extract_strided_slice %0 {offsets = [0, 4], sizes = [8, 1], strides = [1, 1]} : vector<8x24xi32> to vector<8x1xi32>
    %24 = vector.broadcast %23 : vector<8x1xi32> to vector<8x192xi32>
    %25 = arith.cmpi eq, %24, %1 : vector<8x192xi32>
    %26 = arith.extui %25 : vector<8x192xi1> to vector<8x192xi32>
    %27 = arith.addi %22, %26 : vector<8x192xi32>
    %28 = vector.extract_strided_slice %0 {offsets = [0, 5], sizes = [8, 1], strides = [1, 1]} : vector<8x24xi32> to vector<8x1xi32>
    %29 = vector.broadcast %28 : vector<8x1xi32> to vector<8x192xi32>
    %30 = arith.cmpi eq, %29, %1 : vector<8x192xi32>
    %31 = arith.extui %30 : vector<8x192xi1> to vector<8x192xi32>
    %32 = arith.addi %27, %31 : vector<8x192xi32>
    %33 = vector.extract_strided_slice %0 {offsets = [0, 6], sizes = [8, 1], strides = [1, 1]} : vector<8x24xi32> to vector<8x1xi32>
    %34 = vector.broadcast %33 : vector<8x1xi32> to vector<8x192xi32>
    %35 = arith.cmpi eq, %34, %1 : vector<8x192xi32>
    %36 = arith.extui %35 : vector<8x192xi1> to vector<8x192xi32>
    %37 = arith.addi %32, %36 : vector<8x192xi32>
    %38 = vector.extract_strided_slice %0 {offsets = [0, 7], sizes = [8, 1], strides = [1, 1]} : vector<8x24xi32> to vector<8x1xi32>
    %39 = vector.broadcast %38 : vector<8x1xi32> to vector<8x192xi32>
    %40 = arith.cmpi eq, %39, %1 : vector<8x192xi32>
    %41 = arith.extui %40 : vector<8x192xi1> to vector<8x192xi32>
    %42 = arith.addi %37, %41 : vector<8x192xi32>
    %43 = vector.extract_strided_slice %0 {offsets = [0, 8], sizes = [8, 1], strides = [1, 1]} : vector<8x24xi32> to vector<8x1xi32>
    %44 = vector.broadcast %43 : vector<8x1xi32> to vector<8x192xi32>
    %45 = arith.cmpi eq, %44, %1 : vector<8x192xi32>
    %46 = arith.extui %45 : vector<8x192xi1> to vector<8x192xi32>
    %47 = arith.addi %42, %46 : vector<8x192xi32>
    %48 = vector.extract_strided_slice %0 {offsets = [0, 9], sizes = [8, 1], strides = [1, 1]} : vector<8x24xi32> to vector<8x1xi32>
    %49 = vector.broadcast %48 : vector<8x1xi32> to vector<8x192xi32>
    %50 = arith.cmpi eq, %49, %1 : vector<8x192xi32>
    %51 = arith.extui %50 : vector<8x192xi1> to vector<8x192xi32>
    %52 = arith.addi %47, %51 : vector<8x192xi32>
    %53 = vector.extract_strided_slice %0 {offsets = [0, 10], sizes = [8, 1], strides = [1, 1]} : vector<8x24xi32> to vector<8x1xi32>
    %54 = vector.broadcast %53 : vector<8x1xi32> to vector<8x192xi32>
    %55 = arith.cmpi eq, %54, %1 : vector<8x192xi32>
    %56 = arith.extui %55 : vector<8x192xi1> to vector<8x192xi32>
    %57 = arith.addi %52, %56 : vector<8x192xi32>
    %58 = vector.extract_strided_slice %0 {offsets = [0, 11], sizes = [8, 1], strides = [1, 1]} : vector<8x24xi32> to vector<8x1xi32>
    %59 = vector.broadcast %58 : vector<8x1xi32> to vector<8x192xi32>
    %60 = arith.cmpi eq, %59, %1 : vector<8x192xi32>
    %61 = arith.extui %60 : vector<8x192xi1> to vector<8x192xi32>
    %62 = arith.addi %57, %61 : vector<8x192xi32>
    %63 = vector.extract_strided_slice %0 {offsets = [0, 12], sizes = [8, 1], strides = [1, 1]} : vector<8x24xi32> to vector<8x1xi32>
    %64 = vector.broadcast %63 : vector<8x1xi32> to vector<8x192xi32>
    %65 = arith.cmpi eq, %64, %1 : vector<8x192xi32>
    %66 = arith.extui %65 : vector<8x192xi1> to vector<8x192xi32>
    %67 = arith.addi %62, %66 : vector<8x192xi32>
    %68 = vector.extract_strided_slice %0 {offsets = [0, 13], sizes = [8, 1], strides = [1, 1]} : vector<8x24xi32> to vector<8x1xi32>
    %69 = vector.broadcast %68 : vector<8x1xi32> to vector<8x192xi32>
    %70 = arith.cmpi eq, %69, %1 : vector<8x192xi32>
    %71 = arith.extui %70 : vector<8x192xi1> to vector<8x192xi32>
    %72 = arith.addi %67, %71 : vector<8x192xi32>
    %73 = vector.extract_strided_slice %0 {offsets = [0, 14], sizes = [8, 1], strides = [1, 1]} : vector<8x24xi32> to vector<8x1xi32>
    %74 = vector.broadcast %73 : vector<8x1xi32> to vector<8x192xi32>
    %75 = arith.cmpi eq, %74, %1 : vector<8x192xi32>
    %76 = arith.extui %75 : vector<8x192xi1> to vector<8x192xi32>
    %77 = arith.addi %72, %76 : vector<8x192xi32>
    %78 = vector.extract_strided_slice %0 {offsets = [0, 15], sizes = [8, 1], strides = [1, 1]} : vector<8x24xi32> to vector<8x1xi32>
    %79 = vector.broadcast %78 : vector<8x1xi32> to vector<8x192xi32>
    %80 = arith.cmpi eq, %79, %1 : vector<8x192xi32>
    %81 = arith.extui %80 : vector<8x192xi1> to vector<8x192xi32>
    %82 = arith.addi %77, %81 : vector<8x192xi32>
    %83 = vector.extract_strided_slice %0 {offsets = [0, 16], sizes = [8, 1], strides = [1, 1]} : vector<8x24xi32> to vector<8x1xi32>
    %84 = vector.broadcast %83 : vector<8x1xi32> to vector<8x192xi32>
    %85 = arith.cmpi eq, %84, %1 : vector<8x192xi32>
    %86 = arith.extui %85 : vector<8x192xi1> to vector<8x192xi32>
    %87 = arith.addi %82, %86 : vector<8x192xi32>
    %88 = vector.extract_strided_slice %0 {offsets = [0, 17], sizes = [8, 1], strides = [1, 1]} : vector<8x24xi32> to vector<8x1xi32>
    %89 = vector.broadcast %88 : vector<8x1xi32> to vector<8x192xi32>
    %90 = arith.cmpi eq, %89, %1 : vector<8x192xi32>
    %91 = arith.extui %90 : vector<8x192xi1> to vector<8x192xi32>
    %92 = arith.addi %87, %91 : vector<8x192xi32>
    %93 = vector.extract_strided_slice %0 {offsets = [0, 18], sizes = [8, 1], strides = [1, 1]} : vector<8x24xi32> to vector<8x1xi32>
    %94 = vector.broadcast %93 : vector<8x1xi32> to vector<8x192xi32>
    %95 = arith.cmpi eq, %94, %1 : vector<8x192xi32>
    %96 = arith.extui %95 : vector<8x192xi1> to vector<8x192xi32>
    %97 = arith.addi %92, %96 : vector<8x192xi32>
    %98 = vector.extract_strided_slice %0 {offsets = [0, 19], sizes = [8, 1], strides = [1, 1]} : vector<8x24xi32> to vector<8x1xi32>
    %99 = vector.broadcast %98 : vector<8x1xi32> to vector<8x192xi32>
    %100 = arith.cmpi eq, %99, %1 : vector<8x192xi32>
    %101 = arith.extui %100 : vector<8x192xi1> to vector<8x192xi32>
    %102 = arith.addi %97, %101 : vector<8x192xi32>
    %103 = vector.extract_strided_slice %0 {offsets = [0, 20], sizes = [8, 1], strides = [1, 1]} : vector<8x24xi32> to vector<8x1xi32>
    %104 = vector.broadcast %103 : vector<8x1xi32> to vector<8x192xi32>
    %105 = arith.cmpi eq, %104, %1 : vector<8x192xi32>
    %106 = arith.extui %105 : vector<8x192xi1> to vector<8x192xi32>
    %107 = arith.addi %102, %106 : vector<8x192xi32>
    %108 = vector.extract_strided_slice %0 {offsets = [0, 21], sizes = [8, 1], strides = [1, 1]} : vector<8x24xi32> to vector<8x1xi32>
    %109 = vector.broadcast %108 : vector<8x1xi32> to vector<8x192xi32>
    %110 = arith.cmpi eq, %109, %1 : vector<8x192xi32>
    %111 = arith.extui %110 : vector<8x192xi1> to vector<8x192xi32>
    %112 = arith.addi %107, %111 : vector<8x192xi32>
    %113 = vector.extract_strided_slice %0 {offsets = [0, 22], sizes = [8, 1], strides = [1, 1]} : vector<8x24xi32> to vector<8x1xi32>
    %114 = vector.broadcast %113 : vector<8x1xi32> to vector<8x192xi32>
    %115 = arith.cmpi eq, %114, %1 : vector<8x192xi32>
    %116 = arith.extui %115 : vector<8x192xi1> to vector<8x192xi32>
    %117 = arith.addi %112, %116 : vector<8x192xi32>
    %118 = vector.extract_strided_slice %0 {offsets = [0, 23], sizes = [8, 1], strides = [1, 1]} : vector<8x24xi32> to vector<8x1xi32>
    %119 = vector.broadcast %118 : vector<8x1xi32> to vector<8x192xi32>
    %120 = arith.cmpi eq, %119, %1 : vector<8x192xi32>
    %121 = arith.extui %120 : vector<8x192xi1> to vector<8x192xi32>
    %122 = arith.addi %117, %121 : vector<8x192xi32>
    %123 = arith.sitofp %122 : vector<8x192xi32> to vector<8x192xf32>
    %124 = arith.truncf %123 : vector<8x192xf32> to vector<8x192xbf16>
    %c0_1 = arith.constant 0 : index
    %c0_2 = arith.constant 0 : index
    %125 = vector.load %arg2[%c0_1, %c0_2] : memref<192x32xbf16, #tpu.memory_space<vmem>>, vector<192x32xbf16>
    %cst = arith.constant dense<0.000000e+00> : vector<8x32xf32>
    %126 = tpu.matmul %124, %125, %cst {dimension_numbers = #tpu.dot_dimension_numbers<[1], [0], [0], [1], [0, 0, 1, 1], [], []>} : vector<8x192xbf16>, vector<192x32xbf16>, vector<8x32xf32> -> vector<8x32xf32>
    %cst_3 = arith.constant 1.250000e-01 : f32
    %127 = vector.broadcast %cst_3 : f32 to vector<8x32xf32>
    %128 = arith.mulf %126, %127 : vector<8x32xf32>
    %c0_4 = arith.constant 0 : index
    %c0_5 = arith.constant 0 : index
    %129 = vector.load %arg3[%c0_4, %c0_5] : memref<1x32xf32, #tpu.memory_space<vmem>>, vector<1x32xf32>
    %130 = vector.broadcast %129 : vector<1x32xf32> to vector<8x32xf32>
    %131 = arith.addf %128, %130 : vector<8x32xf32>
    %cst_6 = arith.constant 0.000000e+00 : f32
    %132 = vector.broadcast %cst_6 : f32 to vector<8x32xf32>
    %133 = arith.maximumf %131, %132 : vector<8x32xf32>
    %c0_7 = arith.constant 0 : index
    %c0_8 = arith.constant 0 : index
    %134 = vector.load %arg4[%c0_7, %c0_8] : memref<1x32xf32, #tpu.memory_space<vmem>>, vector<1x32xf32>
    %135 = vector.broadcast %134 : vector<1x32xf32> to vector<8x32xf32>
    %136 = arith.mulf %133, %135 : vector<8x32xf32>
    %cst_9 = arith.constant dense<0.000000e+00> : vector<8xf32>
    %137 = vector.multi_reduction <add>, %136, %cst_9 [1] : vector<8x32xf32> to vector<8xf32>
    %138 = vector.shape_cast %137 : vector<8xf32> to vector<8x1xf32>
    %c0_10 = arith.constant 0 : index
    %c0_11 = arith.constant 0 : index
    %139 = vector.load %arg5[%c0_10, %c0_11] : memref<1x128xf32, #tpu.memory_space<vmem>>, vector<1x128xf32>
    %140 = vector.broadcast %138 : vector<8x1xf32> to vector<8x128xf32>
    %141 = vector.broadcast %139 : vector<1x128xf32> to vector<8x128xf32>
    %142 = arith.addf %140, %141 : vector<8x128xf32>
    %c0_12 = arith.constant 0 : index
    %c0_13 = arith.constant 0 : index
    %143 = vector.load %arg6[%c0_12, %c0_13] : memref<8x128xf32, #tpu.memory_space<vmem>>, vector<8x128xf32>
    tpu.vector_store %arg6[%c0_12, %c0_13], %142 {strides = array<i32>} : memref<8x128xf32, #tpu.memory_space<vmem>>, vector<8x128xf32>,
    return
  }
  func.func @transform_0(%arg0: i32) -> (i32, i32) {
    %c0_i32 = arith.constant 0 : i32
    %c0_i32_0 = arith.constant 0 : i32
    return %arg0, %c0_i32 : i32, i32
  }
  func.func @transform_1(%arg0: i32) -> (i32, i32) {
    %c0_i32 = arith.constant 0 : i32
    %c0_i32_0 = arith.constant 0 : i32
    %c0_i32_1 = arith.constant 0 : i32
    return %c0_i32, %c0_i32_0 : i32, i32
  }
  func.func @transform_2(%arg0: i32) -> (i32, i32) {
    %c0_i32 = arith.constant 0 : i32
    %c0_i32_0 = arith.constant 0 : i32
    %c0_i32_1 = arith.constant 0 : i32
    return %c0_i32, %c0_i32_0 : i32, i32
  }
  func.func @transform_3(%arg0: i32) -> (i32, i32) {
    %c0_i32 = arith.constant 0 : i32
    %c0_i32_0 = arith.constant 0 : i32
    %c0_i32_1 = arith.constant 0 : i32
    return %c0_i32, %c0_i32_0 : i32, i32
  }
  func.func @transform_4(%arg0: i32) -> (i32, i32) {
    %c0_i32 = arith.constant 0 : i32
    %c0_i32_0 = arith.constant 0 : i32
    %c0_i32_1 = arith.constant 0 : i32
    return %c0_i32, %c0_i32_0 : i32, i32
  }
  func.func @transform_5(%arg0: i32) -> (i32, i32) {
    %c0_i32 = arith.constant 0 : i32
    %c0_i32_0 = arith.constant 0 : i32
    return %arg0, %c0_i32 : i32, i32
  }
}

</mosaic_0001>

<bundles_post_ra>
// kernel: por_forward.1
= control target key start
LH: loop header
LB: loop body
LE: loop exit
PB: predicated region body
PF: predicated region fallthrough
CT: control target
= control target key end

     0   :  { %v494_v0 = vmov 2   ;;  %v495_v1 = vmov 0   ;;  %v496_v3 = vmov 3   ;;  %v497_v4 = vmov 1   ;;  %s739_s0 = inlined_call_operand.vmem [shape: s32[8,24], index: 0, kind: input, shape index: {}]   ;;  %s740_s1 = inlined_call_operand.vmem [shape: bf16[192,32], index: 1, kind: input, shape index: {}]   ;;  %s741_s2 = inlined_call_operand.vmem [shape: f32[1,32], index: 2, kind: input, shape index: {}]   ;;  %s742_s3 = inlined_call_operand.vmem [shape: f32[1,32], index: 3, kind: input, shape index: {}]   ;;  %s743_s4 = inlined_call_operand.vmem [shape: f32[1,128], index: 4, kind: input, shape index: {}]   ;;  %s744_s5 = inlined_call_operand.vmem [shape: f32[8,128], index: 5, kind: output, shape index: {}]  }
   0x1   :  { %460 = vset.pattern.permute.xlu1 %v494_v0  ;;  %458 = vset.pattern.permute.xlu0 %v495_v1  ;;  %v552_v2 = vld [vmem:[%s739_s0] sm:$0xff]  ;;  %v498_v5 = vmov 4   ;;  %v499_v6 = vmov 5   ;;  %v500_v7 = vmov 6   ;;  %v501_v8 = vmov 8   ;;  %v483_v18 = vld [vmem:[%s740_s1 + $0x8] sm:$0xff]  }
   0x2   :  { %42 = vperm.xlu1 %460, %v552_v2   ;;  %26 = vperm.xlu0 %458, %v552_v2   ;;  %v502_v9 = vmov 7   ;;  %v503_v10 = vmov 11   ;;  %v504_v11 = vmov 9   ;;  %v505_v12 = vmov 14   ;;  %v482_v15 = vld [vmem:[%s740_s1] sm:$0xff]   ;;  %v484_v21 = vld [vmem:[%s740_s1 + $0x10] sm:$0xff]  }
   0x3   :  { %343 = vmatprep.subr.bf16.mxu0 %v495_v1  ;;  %v506_v13 = vmov 10   ;;  %v507_v14 = vmov 17   ;;  %v508_v16 = vmov 12   ;;  %v509_v17 = vmov 20   ;;  %v485_v23 = vld [vmem:[%s740_s1 + $0x18] sm:$0xff]   ;;  %v486_v25 = vld [vmem:[%s740_s1 + $0x20] sm:$0xff]  }
   0x4   :  { %344 = vmatpush1.bf16.msra.mxu0 %v482_v15  ;;  %v510_v19 = vmov 13   ;;  %v511_v20 = vmov 23   ;;  %v512_v22 = vmov 15   ;;  %v513_v24 = vmov 16   ;;  %v487_v26 = vld [vmem:[%s740_s1 + $0x28] sm:$0xff]   ;;  %v488_v28 = vld [vmem:[%s740_s1 + $0x30] sm:$0xff]  }
   0x5   :  { %345 = vmatprep.subr.bf16.mxu0 %v495_v1  ;;  %v514_v27 = vmov 18   ;;  %v515_v29 = vmov 19   ;;  %v489_v30 = vld [vmem:[%s740_s1 + $0x38] sm:$0xff]   ;;  %v516_v31 = vmov 21   ;;  %v490_v32 = vld [vmem:[%s740_s1 + $0x40] sm:$0xff]   ;;  %v517_v33 = vmov 22  }
   0x6   :  { %461 = vset.pattern.permute.xlu1 %v496_v3  ;;  %459 = vset.pattern.permute.xlu0 %v497_v4  ;;  %v491_v34 = vld [vmem:[%s740_s1 + $0x48] sm:$0xff]   ;;  %v492_v35 = vld [vmem:[%s740_s1 + $0x50] sm:$0xff]   ;;  %v493_v36 = vld [vmem:[%s740_s1 + $0x58] sm:$0xff]   ;;  %v22_v37 = vlaneseq }
   0x7   :  { %51 = vperm.xlu1 %461, %v552_v2   ;;  %33 = vperm.xlu0 %459, %v552_v2  }
   0x8   :  { %346 = vmatpush1.bf16.msra.mxu0 %v483_v18  ;;  %v626_v38 = vand.u32 127, %v22_v37 }
   0x9   :  { %347 = vmatprep.subr.bf16.mxu0 %v495_v1 }
   0xa   :  { %v629_v39 = vadd.s32 128, %v626_v38 }
   0xb   :  { %462 = vset.pattern.permute.xlu1 %v498_v5  ;;  %463 = vset.pattern.permute.xlu0 %v499_v6 }
   0xc   :  { %60 = vperm.xlu1 %462, %v552_v2   ;;  %69 = vperm.xlu0 %463, %v552_v2  }
   0xd   :  { %348 = vmatpush1.bf16.msra.mxu0 %v484_v21 }
   0xe   :  { %349 = vmatprep.subr.bf16.mxu0 %v495_v1 }
  0x10   :  { %464 = vset.pattern.permute.xlu1 %v500_v7  ;;  %466 = vset.pattern.permute.xlu0 %v501_v8 }
  0x11   :  { %78 = vperm.xlu1 %464, %v552_v2   ;;  %96 = vperm.xlu0 %466, %v552_v2  }
  0x12   :  { %350 = vmatpush1.bf16.msra.mxu0 %v485_v23 }
  0x13   :  { %351 = vmatprep.subr.bf16.mxu0 %v495_v1 }
  0x15   :  { %465 = vset.pattern.permute.xlu1 %v502_v9  ;;  %469 = vset.pattern.permute.xlu0 %v503_v10 }
  0x16   :  { %87 = vperm.xlu1 %465, %v552_v2   ;;  %123 = vperm.xlu0 %469, %v552_v2  }
  0x17   :  { %352 = vmatpush1.bf16.msra.mxu0 %v486_v25 }
  0x18   :  { %353 = vmatprep.subr.bf16.mxu0 %v495_v1 }
  0x1a   :  { %467 = vset.pattern.permute.xlu1 %v504_v11  ;;  %472 = vset.pattern.permute.xlu0 %v505_v12 }
  0x1b   :  { %105 = vperm.xlu1 %467, %v552_v2   ;;  %150 = vperm.xlu0 %472, %v552_v2  }
  0x1c   :  { %354 = vmatpush1.bf16.msra.mxu0 %v487_v26 }
  0x1d   :  { %355 = vmatprep.subr.bf16.mxu0 %v495_v1 }
  0x1f   :  { %468 = vset.pattern.permute.xlu1 %v506_v13  ;;  %475 = vset.pattern.permute.xlu0 %v507_v14 }
  0x20   :  { %114 = vperm.xlu1 %468, %v552_v2   ;;  %177 = vperm.xlu0 %475, %v552_v2  }
  0x21   :  { %356 = vmatpush1.bf16.msra.mxu0 %v488_v28 }
  0x22   :  { %357 = vmatprep.subr.bf16.mxu0 %v495_v1 }
  0x24   :  { %470 = vset.pattern.permute.xlu1 %v508_v16  ;;  %478 = vset.pattern.permute.xlu0 %v509_v17 }
  0x25   :  { %132 = vperm.xlu1 %470, %v552_v2   ;;  %204 = vperm.xlu0 %478, %v552_v2  }
  0x26   :  { %358 = vmatpush1.bf16.msra.mxu0 %v489_v30 }
  0x27   :  { %359 = vmatprep.subr.bf16.mxu0 %v495_v1 }
  0x29   :  { %471 = vset.pattern.permute.xlu1 %v510_v19  ;;  %481 = vset.pattern.permute.xlu0 %v511_v20 }
  0x2a   :  { %141 = vperm.xlu1 %471, %v552_v2   ;;  %231 = vperm.xlu0 %481, %v552_v2  }
  0x2b   :  { %360 = vmatpush1.bf16.msra.mxu0 %v490_v32 }
  0x2c   :  { %361 = vmatprep.subr.bf16.mxu0 %v495_v1 }
  0x2e   :  { %473 = vset.pattern.permute.xlu1 %v512_v22 }
  0x2f   :  { %159 = vperm.xlu1 %473, %v552_v2   ;;  %362 = vmatpush1.bf16.msra.mxu0 %v491_v34 }
  0x30   :  { %363 = vmatprep.subr.bf16.mxu0 %v495_v1 }
  0x33   :  { %474 = vset.pattern.permute.xlu1 %v513_v24  ;;  %364 = vmatpush1.bf16.msra.mxu0 %v492_v35 }
  0x34   :  { %168 = vperm.xlu1 %474, %v552_v2   ;;  %365 = vmatprep.subr.bf16.mxu0 %v495_v1 }
  0x37   :  { %366 = vmatpush1.bf16.msra.mxu0 %v493_v36 }
  0x38   :  { %476 = vset.pattern.permute.xlu1 %v514_v27 }
  0x39   :  { %186 = vperm.xlu1 %476, %v552_v2  }
  0x3d   :  { %477 = vset.pattern.permute.xlu1 %v515_v29 }
  0x3e   :  { %195 = vperm.xlu1 %477, %v552_v2  }
  0x42   :  { %479 = vset.pattern.permute.xlu1 %v516_v31 }
  0x43   :  { %213 = vperm.xlu1 %479, %v552_v2  }
  0x47   :  { %480 = vset.pattern.permute.xlu1 %v517_v33 }
  0x48   :  { %222 = vperm.xlu1 %480, %v552_v2  }
  0x81   :  { %v43_v40 = vpop.permute.xlu1 %42  ;;  %v27_v41 = vpop.permute.xlu0 %26 }
  0x82   :  { %vm28_vm0 = vcmp.eq.s32.totalorder %v27_v41, %v626_v38  ;;  %vm29_vm1 = vcmp.eq.s32.totalorder %v27_v41, %v629_v39  ;;  %vm44_vm2 = vcmp.eq.s32.totalorder %v43_v40, %v626_v38  ;;  %vm45_vm3 = vcmp.eq.s32.totalorder %v43_v40, %v629_v39 }
  0x83   :  { %v30_v42 = vsel %vm28_vm0, 1, %v495_v1  ;;  %v31_v43 = vsel %vm29_vm1, 1, %v495_v1  ;;  %v46_v50 = vsel %vm44_vm2, 1, %v495_v1  ;;  %v47_v51 = vsel %vm45_vm3, 1, %v495_v1 }
  0x86   :  { %v52_v44 = vpop.permute.xlu1 %51  ;;  %v34_v45 = vpop.permute.xlu0 %33 }
  0x87   :  { %vm35_vm4 = vcmp.eq.s32.totalorder %v34_v45, %v626_v38  ;;  %vm36_vm5 = vcmp.eq.s32.totalorder %v34_v45, %v629_v39  ;;  %vm53_vm6 = vcmp.eq.s32.totalorder %v52_v44, %v626_v38  ;;  %vm54_vm7 = vcmp.eq.s32.totalorder %v52_v44, %v629_v39 }
  0x88   :  { %v37_v46 = vsel %vm35_vm4, 1, %v495_v1  ;;  %v38_v47 = vsel %vm36_vm5, 1, %v495_v1  ;;  %v55_v52 = vsel %vm53_vm6, 1, %v495_v1  ;;  %v56_v53 = vsel %vm54_vm7, 1, %v495_v1 }
  0x89   :  { %v39_v48 = vadd.s32 %v37_v46, %v30_v42  ;;  %v40_v49 = vadd.s32 %v38_v47, %v31_v43 }
  0x8b   :  { %v48_v54 = vadd.s32 %v46_v50, %v39_v48  ;;  %v49_v55 = vadd.s32 %v47_v51, %v40_v49  ;;  %v61_v56 = vpop.permute.xlu1 %60  ;;  %v70_v57 = vpop.permute.xlu0 %69 }
  0x8c   :  { %vm62_vm8 = vcmp.eq.s32.totalorder %v61_v56, %v626_v38  ;;  %vm63_vm9 = vcmp.eq.s32.totalorder %v61_v56, %v629_v39  ;;  %vm71_vm10 = vcmp.eq.s32.totalorder %v70_v57, %v626_v38  ;;  %vm72_vm11 = vcmp.eq.s32.totalorder %v70_v57, %v629_v39 }
  0x8d   :  { %v57_v58 = vadd.s32 %v55_v52, %v48_v54  ;;  %v58_v59 = vadd.s32 %v56_v53, %v49_v55  ;;  %v64_v60 = vsel %vm62_vm8, 1, %v495_v1  ;;  %v65_v61 = vsel %vm63_vm9, 1, %v495_v1 }
  0x8e   :  { %v73_v0 = vsel %vm71_vm10, 1, %v495_v1  ;;  %v74_v2 = vsel %vm72_vm11, 1, %v495_v1 }
  0x8f   :  { %v66_v62 = vadd.s32 %v64_v60, %v57_v58  ;;  %v67_v63 = vadd.s32 %v65_v61, %v58_v59 }
  0x90   :  { %v79_v3 = vpop.permute.xlu1 %78  ;;  %v97_v6 = vpop.permute.xlu0 %96 }
  0x91   :  { %vm80_vm12 = vcmp.eq.s32.totalorder %v79_v3, %v626_v38  ;;  %vm81_vm13 = vcmp.eq.s32.totalorder %v79_v3, %v629_v39  ;;  %v75_v4 = vadd.s32 %v73_v0, %v66_v62  ;;  %v76_v5 = vadd.s32 %v74_v2, %v67_v63 }
  0x92   :  { %v82_v7 = vsel %vm80_vm12, 1, %v495_v1  ;;  %v83_v8 = vsel %vm81_vm13, 1, %v495_v1  ;;  %vm98_vm14 = vcmp.eq.s32.totalorder %v97_v6, %v626_v38  ;;  %vm99_vm15 = vcmp.eq.s32.totalorder %v97_v6, %v629_v39 }
  0x93   :  { %v84_v10 = vadd.s32 %v82_v7, %v75_v4  ;;  %v85_v11 = vadd.s32 %v83_v8, %v76_v5  ;;  %v100_v16 = vsel %vm98_vm14, 1, %v495_v1  ;;  %v101_v17 = vsel %vm99_vm15, 1, %v495_v1 }
  0x95   :  { %v88_v9 = vpop.permute.xlu1 %87  ;;  %v124_v21 = vpop.permute.xlu0 %123 }
  0x96   :  { %vm89_vm0 = vcmp.eq.s32.totalorder %v88_v9, %v626_v38  ;;  %vm90_vm1 = vcmp.eq.s32.totalorder %v88_v9, %v629_v39  ;;  %vm125_vm4 = vcmp.eq.s32.totalorder %v124_v21, %v626_v38  ;;  %vm126_vm5 = vcmp.eq.s32.totalorder %v124_v21, %v629_v39 }
  0x97   :  { %v91_v12 = vsel %vm89_vm0, 1, %v495_v1  ;;  %v92_v13 = vsel %vm90_vm1, 1, %v495_v1  ;;  %v127_v31 = vsel %vm125_vm4, 1, %v495_v1  ;;  %v128_v32 = vsel %vm126_vm5, 1, %v495_v1 }
  0x98   :  { %v93_v14 = vadd.s32 %v91_v12, %v84_v10  ;;  %v94_v15 = vadd.s32 %v92_v13, %v85_v11 }
  0x9a   :  { %v106_v18 = vpop.permute.xlu1 %105  ;;  %v102_v19 = vadd.s32 %v100_v16, %v93_v14  ;;  %v103_v20 = vadd.s32 %v101_v17, %v94_v15  ;;  %v151_v36 = vpop.permute.xlu0 %150 }
  0x9b   :  { %vm107_vm2 = vcmp.eq.s32.totalorder %v106_v18, %v626_v38  ;;  %vm108_vm3 = vcmp.eq.s32.totalorder %v106_v18, %v629_v39  ;;  %vm152_vm10 = vcmp.eq.s32.totalorder %v151_v36, %v626_v38  ;;  %vm153_vm11 = vcmp.eq.s32.totalorder %v151_v36, %v629_v39 }
  0x9c   :  { %v109_v22 = vsel %vm107_vm2, 1, %v495_v1  ;;  %v110_v23 = vsel %vm108_vm3, 1, %v495_v1  ;;  %v154_v48 = vsel %vm152_vm10, 1, %v495_v1  ;;  %v155_v49 = vsel %vm153_vm11, 1, %v495_v1 }
  0x9d   :  { %v111_v25 = vadd.s32 %v109_v22, %v102_v19  ;;  %v112_v26 = vadd.s32 %v110_v23, %v103_v20 }
  0x9f   :  { %v115_v24 = vpop.permute.xlu1 %114  ;;  %v178_v53 = vpop.permute.xlu0 %177 }
  0xa0   :  { %vm116_vm6 = vcmp.eq.s32.totalorder %v115_v24, %v626_v38  ;;  %vm117_vm7 = vcmp.eq.s32.totalorder %v115_v24, %v629_v39  ;;  %vm179_vm0 = vcmp.eq.s32.totalorder %v178_v53, %v626_v38  ;;  %vm180_vm1 = vcmp.eq.s32.totalorder %v178_v53, %v629_v39 }
  0xa1   :  { %v118_v27 = vsel %vm116_vm6, 1, %v495_v1  ;;  %v119_v28 = vsel %vm117_vm7, 1, %v495_v1  ;;  %v181_v63 = vsel %vm179_vm0, 1, %v495_v1  ;;  %v182_v0 = vsel %vm180_vm1, 1, %v495_v1 }
  0xa2   :  { %v120_v29 = vadd.s32 %v118_v27, %v111_v25  ;;  %v121_v30 = vadd.s32 %v119_v28, %v112_v26  ;;  %vm339_vm0 = vcmask 523264   ;;  %vm401_vm1 = vcmask 261120  }
  0xa4   :  { %v133_v33 = vpop.permute.xlu1 %132  ;;  %v129_v34 = vadd.s32 %v127_v31, %v120_v29  ;;  %v130_v35 = vadd.s32 %v128_v32, %v121_v30  ;;  %v205_v5 = vpop.permute.xlu0 %204 }
  0xa5   :  { %vm134_vm8 = vcmp.eq.s32.totalorder %v133_v33, %v626_v38  ;;  %vm135_vm9 = vcmp.eq.s32.totalorder %v133_v33, %v629_v39  ;;  %vm206_vm6 = vcmp.eq.s32.totalorder %v205_v5, %v626_v38  ;;  %vm207_vm7 = vcmp.eq.s32.totalorder %v205_v5, %v629_v39 }
  0xa6   :  { %v136_v37 = vsel %vm134_vm8, 1, %v495_v1  ;;  %v137_v40 = vsel %vm135_vm9, 1, %v495_v1  ;;  %v208_v15 = vsel %vm206_vm6, 1, %v495_v1  ;;  %v209_v16 = vsel %vm207_vm7, 1, %v495_v1 }
  0xa7   :  { %v138_v42 = vadd.s32 %v136_v37, %v129_v34  ;;  %v139_v43 = vadd.s32 %v137_v40, %v130_v35 }
  0xa9   :  { %v142_v41 = vpop.permute.xlu1 %141  ;;  %v232_v18 = vpop.permute.xlu0 %231 }
  0xaa   :  { %vm143_vm12 = vcmp.eq.s32.totalorder %v142_v41, %v626_v38  ;;  %vm144_vm13 = vcmp.eq.s32.totalorder %v142_v41, %v629_v39 }
  0xab   :  { %v145_v44 = vsel %vm143_vm12, 1, %v495_v1  ;;  %v146_v45 = vsel %vm144_vm13, 1, %v495_v1  ;;  %vm233_vm12 = vcmp.eq.s32.totalorder %v232_v18, %v626_v38  ;;  %vm234_vm13 = vcmp.eq.s32.totalorder %v232_v18, %v629_v39 }
  0xac   :  { %v147_v46 = vadd.s32 %v145_v44, %v138_v42  ;;  %v148_v47 = vadd.s32 %v146_v45, %v139_v43  ;;  %v235_v28 = vsel %vm233_vm12, 1, %v495_v1  ;;  %v236_v29 = vsel %vm234_vm13, 1, %v495_v1  ;;  %v432_v44 = vld [vmem:[%s742_s3] ss:$0 sm:$0xff] }
  0xae   :  { %v160_v50 = vpop.permute.xlu1 %159  ;;  %v156_v51 = vadd.s32 %v154_v48, %v147_v46  ;;  %v157_v52 = vadd.s32 %v155_v49, %v148_v47  ;;  %v433_v48 = vld [vmem:[%s743_s4] ss:$0 sm:$0xff] }
  0xaf   :  { %vm161_vm14 = vcmp.eq.s32.totalorder %v160_v50, %v626_v38  ;;  %vm162_vm15 = vcmp.eq.s32.totalorder %v160_v50, %v629_v39 }
  0xb0   :  { %v163_v54 = vsel %vm161_vm14, 1, %v495_v1  ;;  %v164_v55 = vsel %vm162_vm15, 1, %v495_v1 }
  0xb1   :  { %v165_v57 = vadd.s32 %v163_v54, %v156_v51  ;;  %v166_v58 = vadd.s32 %v164_v55, %v157_v52 }
  0xb3   :  { %v169_v56 = vpop.permute.xlu1 %168 }
  0xb4   :  { %vm170_vm2 = vcmp.eq.s32.totalorder %v169_v56, %v626_v38  ;;  %vm171_vm3 = vcmp.eq.s32.totalorder %v169_v56, %v629_v39 }
  0xb5   :  { %v172_v59 = vsel %vm170_vm2, 1, %v495_v1  ;;  %v173_v60 = vsel %vm171_vm3, 1, %v495_v1 }
  0xb6   :  { %v174_v61 = vadd.s32 %v172_v59, %v165_v57  ;;  %v175_v62 = vadd.s32 %v173_v60, %v166_v58 }
  0xb8   :  { %v187_v2 = vpop.permute.xlu1 %186  ;;  %v183_v3 = vadd.s32 %v181_v63, %v174_v61  ;;  %v184_v4 = vadd.s32 %v182_v0, %v175_v62 }
  0xb9   :  { %vm188_vm4 = vcmp.eq.s32.totalorder %v187_v2, %v626_v38  ;;  %vm189_vm5 = vcmp.eq.s32.totalorder %v187_v2, %v629_v39 }
  0xba   :  { %v190_v6 = vsel %vm188_vm4, 1, %v495_v1  ;;  %v191_v7 = vsel %vm189_vm5, 1, %v495_v1 }
  0xbb   :  { %v192_v9 = vadd.s32 %v190_v6, %v183_v3  ;;  %v193_v10 = vadd.s32 %v191_v7, %v184_v4 }
  0xbd   :  { %v196_v8 = vpop.permute.xlu1 %195 }
  0xbe   :  { %vm197_vm8 = vcmp.eq.s32.totalorder %v196_v8, %v626_v38  ;;  %vm198_vm9 = vcmp.eq.s32.totalorder %v196_v8, %v629_v39 }
  0xbf   :  { %v199_v11 = vsel %vm197_vm8, 1, %v495_v1  ;;  %v200_v12 = vsel %vm198_vm9, 1, %v495_v1 }
  0xc0   :  { %v201_v13 = vadd.s32 %v199_v11, %v192_v9  ;;  %v202_v14 = vadd.s32 %v200_v12, %v193_v10 }
  0xc2   :  { %v214_v17 = vpop.permute.xlu1 %213  ;;  %v210_v19 = vadd.s32 %v208_v15, %v201_v13  ;;  %v211_v20 = vadd.s32 %v209_v16, %v202_v14 }
  0xc3   :  { %vm215_vm10 = vcmp.eq.s32.totalorder %v214_v17, %v626_v38  ;;  %vm216_vm11 = vcmp.eq.s32.totalorder %v214_v17, %v629_v39 }
  0xc4   :  { %v217_v21 = vsel %vm215_vm10, 1, %v495_v1  ;;  %v218_v22 = vsel %vm216_vm11, 1, %v495_v1 }
  0xc5   :  { %v219_v24 = vadd.s32 %v217_v21, %v210_v19  ;;  %v220_v25 = vadd.s32 %v218_v22, %v211_v20 }
  0xc7   :  { %v223_v23 = vpop.permute.xlu1 %222 }
  0xc8   :  { %vm224_vm14 = vcmp.eq.s32.totalorder %v223_v23, %v626_v38  ;;  %vm225_vm15 = vcmp.eq.s32.totalorder %v223_v23, %v629_v39  ;;  %v431_v39 = vld [vmem:[%s741_s2] ss:$0 sm:$0xff] }
  0xc9   :  { %v226_v26 = vsel %vm224_vm14, 1, %v495_v1  ;;  %v227_v27 = vsel %vm225_vm15, 1, %v495_v1 }
  0xca   :  { %v228_v30 = vadd.s32 %v226_v26, %v219_v24  ;;  %v229_v31 = vadd.s32 %v227_v27, %v220_v25 }
  0xcc   :  { %v237_v32 = vadd.s32 %v235_v28, %v228_v30  ;;  %v238_v33 = vadd.s32 %v236_v29, %v229_v31 }
  0xce   :  { %v239_v34 = vcvt.s32.f32 %v237_v32  ;;  %v240_v35 = vcvt.s32.f32 %v238_v33 }
  0xd0   :  { %v241_v36 = vpack.c.bf16 %v239_v34, %v239_v34  ;;  %v242_v37 = vpack.c.bf16 %v240_v35, %v240_v35 }
  0xd2   :  { %430 = vmatprep.mubr.msk.bf16.mxu0 %vm339_vm0, %v242_v37 }
  0xd3   :  { %376 = vmatmul.mubr.bf16.vlgmr.msra.gmra.mrb[0].mxu0 %v241_v36 }
 0x1a6   :  { %v377_v38 = vpop.f32.mrb[0].mxu0 }
 0x1a7   :  { %v383_v40 = vmul.f32 0.125, %v377_v38  ;;  %v379_v41 = vpop.f32.mrb[1].mxu0 }
 0x1a8   :  { %v380_v42 = vpop.f32.mrb[2].mxu0 }
 0x1a9   :  { %v391_v1 = vadd.f32 %v431_v39, %v383_v40  ;;  %v381_v43 = vpop.f32.mrb[3].mxu0 }
 0x1ab   :  { %v392_v45 = vmax.f32 %v391_v1, 0.0 }
 0x1ad   :  { %v400_v46 = vmul.f32 %v432_v44, %v392_v45 }
 0x1af   :  { %v402_v47 = vsel %vm401_vm1, %v400_v46, 0.0 }
 0x1b0   :  { %403 = vadd.xlane.f32.xlu1 %v402_v47 }
 0x23d   :  { %v404_v49 = vpop.xlane.xlu1 %403 }
 0x23e   :  { %v412_v50 = vadd.f32 %v433_v48, %v404_v49 }
 0x240   :  { %413 = vst [vmem:[%s744_s5] sm:$0xff] %v412_v50 }

</bundles_post_ra>
